<compile_context>
chip_gen: v6e
topology: v6e:2x2x1
jax: 0.10.0
libtpu: 0.0.40
codegen_flags: <defaults>
</compile_context>

<pallas_src>
import functools

import jax
import jax.numpy as jnp
from jax.experimental import pallas as pl
from jax.experimental.pallas import tpu as pltpu


def lstm_seq_kernel(x_ref, h0c0_ref, w_ih_ref, w_hh_ref, b_ref, hc_ref, xg_ref):
    """One grid step == one LSTM timestep. hc_ref ([2,H]) is the resident carry."""
    t = pl.program_id(0)
    H = hc_ref.shape[-1]

    @pl.when(t == 0)
    def _():
        # Hoisted input projection for the entire sequence: one [S,I]x[I,4H]
        # MXU matmul (no sequential dependency) + fused bias.
        xg_ref[...] = (jnp.dot(x_ref[...], w_ih_ref[...],
                               preferred_element_type=jnp.float32)
                       + b_ref[...])
        # Initialize the recurrent carry from the provided hidden state.
        hc_ref[...] = h0c0_ref[...]

    h = hc_ref[0:1, :]                       # [1, H]
    c = hc_ref[1:2, :]                       # [1, H]

    # Per-step critical path: a single [1,H]x[H,4H] MXU matmul + precomputed x-gates.
    gates = (jnp.dot(h, w_hh_ref[...], preferred_element_type=jnp.float32)
             + xg_ref[pl.ds(t, 1), :])       # [1, 4H]

    # TODO(synk): at H=32 the per-gate slices are sub-128-lane; for large H keep
    # gate blocks 128-lane aligned (or reorder columns) to avoid lane shuffles.
    i_g = jax.nn.sigmoid(gates[:, 0 * H:1 * H])
    f_g = jax.nn.sigmoid(gates[:, 1 * H:2 * H])
    g_g = jnp.tanh(gates[:, 2 * H:3 * H])
    o_g = jax.nn.sigmoid(gates[:, 3 * H:4 * H])

    c_new = f_g * c + i_g * g_g
    h_new = o_g * jnp.tanh(c_new)

    hc_ref[0:1, :] = h_new
    hc_ref[1:2, :] = c_new


def lstm_sequence(x_seq, h0c0, w_ih_t, w_hh_t, b):
    """Run the LSTM over the full sequence in a single pallas_call.

    x_seq: [S, I]  h0c0: [2, H]  w_ih_t: [I, 4H]  w_hh_t: [H, 4H]  b: [1, 4H]
    Returns hc_final: [2, H]  (row 0 = h, row 1 = c).
    """
    S, I = x_seq.shape
    H = w_hh_t.shape[0]
    G = 4 * H

    cost = pl.CostEstimate(
        flops=2 * S * I * G + 2 * S * H * G + 10 * S * H,
        transcendentals=5 * S * H,
        bytes_accessed=4 * (x_seq.size + h0c0.size + w_ih_t.size
                            + w_hh_t.size + b.size + 2 * H),
    )

    return pl.pallas_call(
        lstm_seq_kernel,
        out_shape=jax.ShapeDtypeStruct((2, H), jnp.float32),
        grid_spec=pltpu.PrefetchScalarGridSpec(
            num_scalar_prefetch=0,
            grid=(S,),
            in_specs=[
                pl.BlockSpec((S, I), lambda t: (0, 0)),   # x_seq    (resident)
                pl.BlockSpec((2, H), lambda t: (0, 0)),   # (h0, c0) (resident)
                pl.BlockSpec((I, G), lambda t: (0, 0)),   # W_ih^T   (resident)
                pl.BlockSpec((H, G), lambda t: (0, 0)),   # W_hh^T   (resident)
                pl.BlockSpec((1, G), lambda t: (0, 0)),   # fused bias (resident)
            ],
            out_specs=pl.BlockSpec((2, H), lambda t: (0, 0)),  # resident carry
            scratch_shapes=[pltpu.VMEM((S, G), jnp.float32)],  # precomputed x-gates
        ),
        compiler_params=pltpu.CompilerParams(
            dimension_semantics=("arbitrary",),   # recurrence => sequential grid
        ),
        cost_estimate=cost,
    )(x_seq, h0c0, w_ih_t, w_hh_t, b)


_lstm_sequence_jit = jax.jit(lstm_sequence)


class EncoderRNNPallas:
    """JAX/Pallas equivalent of the PyTorch EncoderRNN (single-layer LSTM)."""

    def __init__(self, input_size, hidden_size, key):
        self.input_size = input_size
        self.hidden_size = hidden_size
        H = hidden_size
        bound = 1.0 / jnp.sqrt(jnp.float32(H))
        k1, k2, k3, k4 = jax.random.split(key, 4)
        # PyTorch nn.LSTM parameter shapes: W_ih (4H, I), W_hh (4H, H), b_* (4H,)
        w_ih = jax.random.uniform(k1, (4 * H, input_size), jnp.float32, -bound, bound)
        w_hh = jax.random.uniform(k2, (4 * H, H), jnp.float32, -bound, bound)
        b_ih = jax.random.uniform(k3, (4 * H,), jnp.float32, -bound, bound)
        b_hh = jax.random.uniform(k4, (4 * H,), jnp.float32, -bound, bound)
        # Store transposed for the row-vector kernel layout; fuse the two biases.
        self.w_ih_t = w_ih.T                         # [I, 4H]
        self.w_hh_t = w_hh.T                         # [H, 4H]
        self.b = (b_ih + b_hh).reshape(1, 4 * H)     # [1, 4H]

    def initHidden(self):
        H = self.hidden_size
        return (jnp.zeros((1, 1, H), jnp.float32), jnp.zeros((1, 1, H), jnp.float32))

    def forward(self, inp, hidden):
        # input.view(1, 1, -1) in PyTorch -> a length-1 sequence of row vectors.
        x_seq = jnp.reshape(inp, (1, -1)).astype(jnp.float32)        # [1, I]
        h, c = hidden                                                # each [1,1,H]
        h0c0 = jnp.concatenate([h.reshape(1, -1), c.reshape(1, -1)], axis=0)
        hc = _lstm_sequence_jit(x_seq, h0c0, self.w_ih_t, self.w_hh_t, self.b)
        H = self.hidden_size
        # output[0, 0] -> shape (H,); hidden states keep (1, 1, H)
        return hc[0], (hc[0].reshape(1, 1, H), hc[1].reshape(1, 1, H))

    def encode(self, input_seq):
        # Full sequence in ONE kernel launch (vs. one pallas_call per timestep).
        x_seq = jnp.asarray(input_seq, jnp.float32).reshape(len(input_seq), -1)
        H = self.hidden_size
        h0c0 = jnp.zeros((2, H), jnp.float32)
        hc = _lstm_sequence_jit(x_seq, h0c0, self.w_ih_t, self.w_hh_t, self.b)
        return (hc[0].reshape(1, 1, H), hc[1].reshape(1, 1, H))


# ----------------------------- pure-JAX reference -----------------------------

def _lstm_ref_step(x_row, h_row, c_row, w_ih_t, w_hh_t, b):
    gates = x_row @ w_ih_t + h_row @ w_hh_t + b
    H = h_row.shape[-1]
    i = jax.nn.sigmoid(gates[:, 0 * H:1 * H])
    f = jax.nn.sigmoid(gates[:, 1 * H:2 * H])
    g = jnp.tanh(gates[:, 2 * H:3 * H])
    o = jax.nn.sigmoid(gates[:, 3 * H:4 * H])
    c_new = f * c_row + i * g
    h_new = o * jnp.tanh(c_new)
    return h_new, c_new


def _lstm_ref_sequence(x_seq, w_ih_t, w_hh_t, b):
    H = w_hh_t.shape[0]
    h = jnp.zeros((1, H), jnp.float32)
    c = jnp.zeros((1, H), jnp.float32)
    for t in range(x_seq.shape[0]):
        h, c = _lstm_ref_step(x_seq[t:t + 1], h, c, w_ih_t, w_hh_t, b)
    return h, c


if __name__ == "__main__":
    INPUT_SIZE = 16
    HIDDEN_SIZE = 32
    SEQ_LEN = 8

    key = jax.random.PRNGKey(0)
    k_params, k_data = jax.random.split(key)
    enc = EncoderRNNPallas(INPUT_SIZE, HIDDEN_SIZE, k_params)

    # Deterministic example inputs: SEQ_LEN vectors of size INPUT_SIZE.
    input_seq = jax.random.normal(k_data, (SEQ_LEN, INPUT_SIZE), jnp.float32)

    # --- single forward step (matches EncoderRNN.forward) ---
    hidden0 = enc.initHidden()
    out, (h1, c1) = enc.forward(input_seq[0], hidden0)
    jax.block_until_ready(out)
    jax.block_until_ready(h1)
    jax.block_until_ready(c1)

    h_ref1, c_ref1 = _lstm_ref_step(
        input_seq[0].reshape(1, -1),
        jnp.zeros((1, HIDDEN_SIZE), jnp.float32),
        jnp.zeros((1, HIDDEN_SIZE), jnp.float32),
        enc.w_ih_t, enc.w_hh_t, enc.b)
    assert out.shape == (HIDDEN_SIZE,)
    assert h1.shape == (1, 1, HIDDEN_SIZE) and c1.shape == (1, 1, HIDDEN_SIZE)
    assert jnp.allclose(out, h_ref1.reshape(-1), atol=1e-5, rtol=1e-5)
    assert jnp.allclose(c1.reshape(-1), c_ref1.reshape(-1), atol=1e-5, rtol=1e-5)

    # --- full encode() over the sequence: ONE kernel launch ---
    h_final, c_final = enc.encode(input_seq)
    jax.block_until_ready(h_final)
    jax.block_until_ready(c_final)

    h_refS, c_refS = _lstm_ref_sequence(input_seq, enc.w_ih_t, enc.w_hh_t, enc.b)
    assert h_final.shape == (1, 1, HIDDEN_SIZE) and c_final.shape == (1, 1, HIDDEN_SIZE)
    assert jnp.allclose(h_final.reshape(-1), h_refS.reshape(-1), atol=1e-5, rtol=1e-5)
    assert jnp.allclose(c_final.reshape(-1), c_refS.reshape(-1), atol=1e-5, rtol=1e-5)

    print("KERNEL_OK")
</pallas_src>

<mosaic_0001>
module attributes {stable_mosaic.version = 11 : i64} {
  func.func @lstm_seq_kernel(%arg0: i32, %arg1: memref<1x16xf32, #tpu.memory_space<vmem>>, %arg2: memref<2x32xf32, #tpu.memory_space<vmem>>, %arg3: memref<16x128xf32, #tpu.memory_space<vmem>>, %arg4: memref<32x128xf32, #tpu.memory_space<vmem>>, %arg5: memref<1x128xf32, #tpu.memory_space<vmem>>, %arg6: memref<2x32xf32, #tpu.memory_space<vmem>>, %arg7: memref<1x128xf32, #tpu.memory_space<vmem>>) attributes {dimension_semantics = [#tpu.dimension_semantics<arbitrary>], iteration_bounds = array<i64: 1>, scalar_prefetch = 0 : i64, scratch_operands = 1 : i64, tpu.core_type = #tpu.core_type<tc>, window_params = [{pipeline_mode = #tpu.pipeline_mode<synchronous>, transform_indices = @transform_0, window_bounds = array<i64: 1, 16>}, {pipeline_mode = #tpu.pipeline_mode<synchronous>, transform_indices = @transform_1, window_bounds = array<i64: 2, 32>}, {pipeline_mode = #tpu.pipeline_mode<synchronous>, transform_indices = @transform_2, window_bounds = array<i64: 16, 128>}, {pipeline_mode = #tpu.pipeline_mode<synchronous>, transform_indices = @transform_3, window_bounds = array<i64: 32, 128>}, {pipeline_mode = #tpu.pipeline_mode<synchronous>, transform_indices = @transform_4, window_bounds = array<i64: 1, 128>}, {pipeline_mode = #tpu.pipeline_mode<synchronous>, transform_indices = @transform_5, window_bounds = array<i64: 2, 32>}]} {
    %c0_i32 = arith.constant 0 : i32
    %0 = arith.cmpi eq, %arg0, %c0_i32 : i32
    %1 = arith.extui %0 : i1 to i32
    %c0_i32_0 = arith.constant 0 : i32
    %2 = arith.cmpi ne, %1, %c0_i32_0 : i32
    scf.if %2 {
      %c0_13 = arith.constant 0 : index
      %c0_14 = arith.constant 0 : index
      %37 = vector.load %arg1[%c0_13, %c0_14] : memref<1x16xf32, #tpu.memory_space<vmem>>, vector<1x16xf32>
      %c0_15 = arith.constant 0 : index
      %c0_16 = arith.constant 0 : index
      %38 = vector.load %arg3[%c0_15, %c0_16] : memref<16x128xf32, #tpu.memory_space<vmem>>, vector<16x128xf32>
      %cst_17 = arith.constant dense<0.000000e+00> : vector<1x128xf32>
      %39 = tpu.matmul %37, %38, %cst_17 {dimension_numbers = #tpu.dot_dimension_numbers<[1], [0], [0], [1], [0, 0, 1, 1], [], []>} : vector<1x16xf32>, vector<16x128xf32>, vector<1x128xf32> -> vector<1x128xf32>
      %c0_18 = arith.constant 0 : index
      %c0_19 = arith.constant 0 : index
      %40 = vector.load %arg5[%c0_18, %c0_19] : memref<1x128xf32, #tpu.memory_space<vmem>>, vector<1x128xf32>
      %41 = arith.addf %39, %40 : vector<1x128xf32>
      %c0_20 = arith.constant 0 : index
      %c0_21 = arith.constant 0 : index
      %42 = vector.load %arg7[%c0_20, %c0_21] : memref<1x128xf32, #tpu.memory_space<vmem>>, vector<1x128xf32>
      tpu.vector_store %arg7[%c0_20, %c0_21], %41 {strides = array<i32>} : memref<1x128xf32, #tpu.memory_space<vmem>>, vector<1x128xf32>,
      %c0_22 = arith.constant 0 : index
      %c0_23 = arith.constant 0 : index
      %43 = vector.load %arg2[%c0_22, %c0_23] : memref<2x32xf32, #tpu.memory_space<vmem>>, vector<2x32xf32>
      %c0_24 = arith.constant 0 : index
      %c0_25 = arith.constant 0 : index
      %44 = vector.load %arg6[%c0_24, %c0_25] : memref<2x32xf32, #tpu.memory_space<vmem>>, vector<2x32xf32>
      tpu.vector_store %arg6[%c0_24, %c0_25], %43 {strides = array<i32>} : memref<2x32xf32, #tpu.memory_space<vmem>>, vector<2x32xf32>,
    } else {
    }
    %c0 = arith.constant 0 : index
    %c0_1 = arith.constant 0 : index
    %3 = vector.load %arg6[%c0, %c0_1] : memref<2x32xf32, #tpu.memory_space<vmem>>, vector<1x32xf32>
    %c1 = arith.constant 1 : index
    %c0_2 = arith.constant 0 : index
    %4 = vector.load %arg6[%c1, %c0_2] : memref<2x32xf32, #tpu.memory_space<vmem>>, vector<1x32xf32>
    %c0_3 = arith.constant 0 : index
    %c0_4 = arith.constant 0 : index
    %5 = vector.load %arg4[%c0_3, %c0_4] : memref<32x128xf32, #tpu.memory_space<vmem>>, vector<32x128xf32>
    %cst = arith.constant dense<0.000000e+00> : vector<1x128xf32>
    %6 = tpu.matmul %3, %5, %cst {dimension_numbers = #tpu.dot_dimension_numbers<[1], [0], [0], [1], [0, 0, 1, 1], [], []>} : vector<1x32xf32>, vector<32x128xf32>, vector<1x128xf32> -> vector<1x128xf32>
    %7 = arith.index_cast %arg0 : i32 to index
    %c0_5 = arith.constant 0 : index
    %8 = vector.load %arg7[%7, %c0_5] : memref<1x128xf32, #tpu.memory_space<vmem>>, vector<1x128xf32>
    %9 = arith.addf %6, %8 : vector<1x128xf32>
    %10 = vector.extract_strided_slice %9 {offsets = [0, 0], sizes = [1, 32], strides = [1, 1]} : vector<1x128xf32> to vector<1x32xf32>
    %11 = arith.negf %10 : vector<1x32xf32>
    %12 = math.exp %11 : vector<1x32xf32>
    %cst_6 = arith.constant 1.000000e+00 : f32
    %13 = vector.broadcast %cst_6 : f32 to vector<1x32xf32>
    %14 = arith.addf %13, %12 : vector<1x32xf32>
    %15 = arith.divf %13, %14 : vector<1x32xf32>
    %16 = vector.extract_strided_slice %9 {offsets = [0, 32], sizes = [1, 32], strides = [1, 1]} : vector<1x128xf32> to vector<1x32xf32>
    %17 = arith.negf %16 : vector<1x32xf32>
    %18 = math.exp %17 : vector<1x32xf32>
    %cst_7 = arith.constant 1.000000e+00 : f32
    %19 = vector.broadcast %cst_7 : f32 to vector<1x32xf32>
    %20 = arith.addf %19, %18 : vector<1x32xf32>
    %21 = arith.divf %19, %20 : vector<1x32xf32>
    %22 = vector.extract_strided_slice %9 {offsets = [0, 64], sizes = [1, 32], strides = [1, 1]} : vector<1x128xf32> to vector<1x32xf32>
    %23 = math.tanh %22 : vector<1x32xf32>
    %24 = vector.extract_strided_slice %9 {offsets = [0, 96], sizes = [1, 32], strides = [1, 1]} : vector<1x128xf32> to vector<1x32xf32>
    %25 = arith.negf %24 : vector<1x32xf32>
    %26 = math.exp %25 : vector<1x32xf32>
    %cst_8 = arith.constant 1.000000e+00 : f32
    %27 = vector.broadcast %cst_8 : f32 to vector<1x32xf32>
    %28 = arith.addf %27, %26 : vector<1x32xf32>
    %29 = arith.divf %27, %28 : vector<1x32xf32>
    %30 = arith.mulf %21, %4 : vector<1x32xf32>
    %31 = arith.mulf %15, %23 : vector<1x32xf32>
    %32 = arith.addf %30, %31 : vector<1x32xf32>
    %33 = math.tanh %32 : vector<1x32xf32>
    %34 = arith.mulf %29, %33 : vector<1x32xf32>
    %c0_9 = arith.constant 0 : index
    %c0_10 = arith.constant 0 : index
    %35 = vector.load %arg6[%c0_9, %c0_10] : memref<2x32xf32, #tpu.memory_space<vmem>>, vector<1x32xf32>
    tpu.vector_store %arg6[%c0_9, %c0_10], %34 {strides = array<i32>} : memref<2x32xf32, #tpu.memory_space<vmem>>, vector<1x32xf32>,
    %c1_11 = arith.constant 1 : index
    %c0_12 = arith.constant 0 : index
    %36 = vector.load %arg6[%c1_11, %c0_12] : memref<2x32xf32, #tpu.memory_space<vmem>>, vector<1x32xf32>
    tpu.vector_store %arg6[%c1_11, %c0_12], %32 {strides = array<i32>} : memref<2x32xf32, #tpu.memory_space<vmem>>, vector<1x32xf32>,
    return
  }
  func.func @transform_0(%arg0: i32) -> (i32, i32) {
    %c0_i32 = arith.constant 0 : i32
    %c0_i32_0 = arith.constant 0 : i32
    %c0_i32_1 = arith.constant 0 : i32
    return %c0_i32, %c0_i32_0 : i32, i32
  }
  func.func @transform_1(%arg0: i32) -> (i32, i32) {
    %c0_i32 = arith.constant 0 : i32
    %c0_i32_0 = arith.constant 0 : i32
    %c0_i32_1 = arith.constant 0 : i32
    return %c0_i32, %c0_i32_0 : i32, i32
  }
  func.func @transform_2(%arg0: i32) -> (i32, i32) {
    %c0_i32 = arith.constant 0 : i32
    %c0_i32_0 = arith.constant 0 : i32
    %c0_i32_1 = arith.constant 0 : i32
    return %c0_i32, %c0_i32_0 : i32, i32
  }
  func.func @transform_3(%arg0: i32) -> (i32, i32) {
    %c0_i32 = arith.constant 0 : i32
    %c0_i32_0 = arith.constant 0 : i32
    %c0_i32_1 = arith.constant 0 : i32
    return %c0_i32, %c0_i32_0 : i32, i32
  }
  func.func @transform_4(%arg0: i32) -> (i32, i32) {
    %c0_i32 = arith.constant 0 : i32
    %c0_i32_0 = arith.constant 0 : i32
    %c0_i32_1 = arith.constant 0 : i32
    return %c0_i32, %c0_i32_0 : i32, i32
  }
  func.func @transform_5(%arg0: i32) -> (i32, i32) {
    %c0_i32 = arith.constant 0 : i32
    %c0_i32_0 = arith.constant 0 : i32
    %c0_i32_1 = arith.constant 0 : i32
    return %c0_i32, %c0_i32_0 : i32, i32
  }
}

</mosaic_0001>

<bundles_post_ra>
// kernel: lstm_sequence.1
= control target key start
LH: loop header
LB: loop body
LE: loop exit
PB: predicated region body
PF: predicated region fallthrough
CT: control target
= control target key end

     0   :  { %10 = vsyncpa [#allocation4], 0  ;;  %s512_s0 = inlined_call_operand.hbm [shape: f32[1,16], index: 0, kind: input, shape index: {}]   ;;  %s513_s1 = inlined_call_operand.hbm [shape: f32[2,32], index: 1, kind: input, shape index: {}]   ;;  %s514_s2 = inlined_call_operand.hbm [shape: f32[16,128], index: 2, kind: input, shape index: {}]   ;;  %s515_s3 = inlined_call_operand.hbm [shape: f32[32,128], index: 3, kind: input, shape index: {}]   ;;  %s516_s4 = inlined_call_operand.vmem [shape: f32[1,128], index: 4, kind: input, shape index: {}]   ;;  %s517_s5 = inlined_call_operand.hbm [shape: f32[2,32], index: 5, kind: output, shape index: {}]  }
   0x1   :  { %11 = vsyncpa [#allocation7], 0 }
   0x2   :  { %12 = vsyncpa [#allocation10], 0 }
   0x3   :  { %13 = vsyncpa [#allocation5], 0  ;;  %s452_s18 = smov [#allocation6]   ;;  %s453_s20 = smov [#allocation3]  }
   0x4   :  { %s30_s19 = sshll.u32 %s452_s18, 4  ;;  %s20_s21 = sshll.u32 %s453_s20, 4  ;;  %s31_s19 = int_to_ptr.vmem [resolvable:$true] %s30_s19  ;;  %s21_s21 = int_to_ptr.vmem [resolvable:$true] %s20_s21 }
   0x5   :  { %s352_s22 = scalar_lea.vmem %s31_s19, 32  ;;  %p357_p1 = scmp.lt.s32.totalorder %s31_s19, %s31_s19 }
   0x6   :  { %p353_p0 = scmp.ne.s32.totalorder %s31_s19, %s352_s22  ;;  %p358_p2 = scmp.lt.s32.totalorder %s352_s22, %s352_s22 }
   0x8   :  { %p359_p3 = por %p358_p2, %p357_p1 }
   0xa   :  { %p360_p4 = pnand %p359_p3, %p353_p0 }
   0xc   :  { %363 = shalt.err (!%p360_p4)
}
   0xd   :  { %33 = dma.hbm_to_vmem [thread:$0]  %s513_s1, 32, %s31_s19, [#allocation7]  }
   0xe   :  { %s372_s25 = scalar_lea.vmem %s21_s21, 16  ;;  %s376_s26 = scalar_lea.vmem %s21_s21, 32 }
   0xf   :  { %p373_p5 = scmp.ne.s32.totalorder %s21_s21, %s372_s25  ;;  %p377_p6 = scmp.lt.s32.totalorder %s21_s21, %s21_s21 }
  0x10   :  { %p378_p7 = scmp.lt.s32.totalorder %s376_s26, %s372_s25 }
  0x12   :  { %p379_p8 = por %p378_p7, %p377_p6 }
  0x14   :  { %p380_p9 = pnand %p379_p8, %p373_p5 }
  0x16   :  { %383 = shalt.err (!%p380_p9)
}
  0x17   :  { %23 = dma.hbm_to_vmem [thread:$0]  %s512_s0, 16, %s21_s21, [#allocation4]  }
  0x18   :  { %s454_s29 = smov [#allocation8]  }
  0x19   :  { %s39_s30 = sshll.u32 %s454_s29, 4  ;;  %s40_s30 = int_to_ptr.vmem [resolvable:$true] %s39_s30 }
  0x1a   :  { %s392_s6 = scalar_lea.vmem %s40_s30, 256  ;;  %p397_p11 = scmp.lt.s32.totalorder %s40_s30, %s40_s30 }
  0x1b   :  { %p393_p10 = scmp.ne.s32.totalorder %s40_s30, %s392_s6  ;;  %p398_p12 = scmp.lt.s32.totalorder %s392_s6, %s392_s6 }
  0x1d   :  { %p399_p13 = por %p398_p12, %p397_p11 }
  0x1f   :  { %p400_p0 = pnand %p399_p13, %p393_p10 }
  0x21   :  { %403 = shalt.err (!%p400_p0)
}
  0x22   :  { %s455_s1 = smov 128   ;;  %s456_s7 = smov 8  }
  0x23   :  { %45 = dma.hbm_to_vmem [thread:$0]  %s514_s2, 256, %s40_s30, [#allocation7], %s455_s1, %s455_s1, %s456_s7  }
  0x24   :  { %s457_s10 = smov [#allocation9]  }
  0x25   :  { %s51_s11 = sshll.u32 %s457_s10, 4  ;;  %s52_s11 = int_to_ptr.vmem [resolvable:$true] %s51_s11 }
  0x26   :  { %s412_s0 = scalar_lea.vmem %s52_s11, 512  ;;  %p417_p2 = scmp.lt.s32.totalorder %s52_s11, %s52_s11 }
  0x27   :  { %p413_p1 = scmp.ne.s32.totalorder %s52_s11, %s412_s0  ;;  %p418_p3 = scmp.lt.s32.totalorder %s412_s0, %s412_s0 }
  0x29   :  { %p419_p4 = por %p418_p3, %p417_p2 }
  0x2b   :  { %p420_p5 = pnand %p419_p4, %p413_p1 }
  0x2d   :  { %423 = shalt.err (!%p420_p5)
}
  0x2e   :  { %57 = dma.hbm_to_vmem [thread:$0]  %s515_s3, 512, %s52_s11, [#allocation10], %s455_s1, %s455_s1, %s456_s7  }
  0x2f   :  { %444 = dma.done.wait [#allocation4], 16  }
  0x30   :  { %445 = vsyncadd [#allocation4], 4294967280 }
  0x31   :  { %446 = dma.done.wait [#allocation7], 288  }
  0x32   :  { %447 = vsyncadd [#allocation7], 4294967008 }
  0x33   :  { %448 = dma.done.wait [#allocation10], 512  }
  0x34   :  { %449 = vsyncadd [#allocation10], 4294966784  ;;  %v458_v0 = vmov 0.0   ;;  %vm459_vm0 = vmmov 0   ;;  %v78_v1 = vld [vmem:[#allocation8 + $0x8] sm:$0xff]  ;;  %v77_v2 = vld [vmem:[#allocation8] sm:$0xff] }
  0x35   :  { %306 = vmatprep.subr.mxu0 %v458_v0  ;;  %310 = vmatprep.mubr.msk.f32.mxu0 %vm459_vm0, %v458_v0  ;;  %vm156_vm1 = vcmask 254976   ;;  %v76_v3 = vld [vmem:[#allocation3] sm:$0x1]  ;;  %vm80_vm2 = vcmask 130048   ;;  %v163_v4 = vld [vmem:[#allocation9 + $0x18] sm:$0xff]  ;;  %v162_v5 = vld [vmem:[#allocation9 + $0x10] sm:$0xff] }
  0x36   :  { %313 = vmatprep.subr.mxu1 %v458_v0  ;;  %321 = vmatprep.mubr.msk.f32.mxu1 %vm459_vm0, %v458_v0  ;;  %v155_v6 = vld [vmem:[#allocation6] sm:$0x3]  ;;  %v160_v8 = vld [vmem:[#allocation9] sm:$0xff]  ;;  %vm165_vm3 = vcmask 261120   ;;  %v79_v10 = vld [vmem:[%s516_s4] sm:$0x1] }
  0x37   :  { %307 = vmatpush3.msra.mxu0 %v78_v1  ;;  %314 = vmatpush3.msra.mxu1 %v163_v4  ;;  %v161_v7 = vld [vmem:[#allocation9 + $0x8] sm:$0xff]  ;;  %157 = vst.msk [vmem:[#allocation11] sm:$0x3] %vm156_vm1, %v155_v6  ;;  %s460_s14 = smov 64   ;;  %s461_s15 = smov 32   ;;  %vm271_vm4 = vcmask 253952  }
  0x38   :  { %308 = vmatprep.subr.mxu0 %v458_v0  ;;  %315 = vmatprep.subr.mxu1 %v458_v0  ;;  %s462_s4 = smov 96   ;;  %s463_s16 = smov [#allocation11]  }
  0x39   :  { %309 = vmatpush3.msra.mxu0 %v77_v2  ;;  %316 = vmatpush3.msra.mxu1 %v162_v5  ;;  %s284_s17 = sshll.u32 %s463_s16, 4  ;;  %s285_s17 = int_to_ptr.vmem [resolvable:$true] %s284_s17 }
  0x3a   :  { %311 = vmatmul.mubr.msk.f32.vlgmr.msra.gmra.mxu0 %vm80_vm2, %v76_v3  ;;  %317 = vmatprep.subr.mxu1 %v458_v0  ;;  %s424_s18 = scalar_lea.vmem %s285_s17, 32  ;;  %p429_p7 = scmp.lt.s32.totalorder %s285_s17, %s285_s17 }
  0x3b   :  { %318 = vmatpush3.msra.mxu1 %v161_v7  ;;  %p425_p6 = scmp.ne.s32.totalorder %s285_s17, %s424_s18  ;;  %p430_p8 = scmp.lt.s32.totalorder %s424_s18, %s424_s18 }
  0x3c   :  { %319 = vmatprep.subr.mxu1 %v458_v0 }
  0x3d   :  { %320 = vmatpush3.msra.mxu1 %v160_v8  ;;  %p431_p9 = por %p430_p8, %p429_p7 }
  0x3e   :  { %v158_v9 = vld [vmem:[#allocation11] sm:$0x1]  ;;  %v159_v19 = vld [vmem:[#allocation11 + $0x1] sm:$0x1] }
  0x3f   :  { %322 = vmatmul.mubr.msk.f32.vlgmr.msra.gmra.mxu1 %vm165_vm3, %v158_v9  ;;  %p432_p10 = pnand %p431_p9, %p425_p6 }
  0xfa   :  { %v150_v11 = vpop.f32.mrf.mxu0 }
  0xfb   :  { %v151_v12 = vadd.f32 %v150_v11, %v79_v10 }
  0xfc   :  { %v312_v13 = vpop.f32.mrf.mxu0 }
  0xfd   :  { %154 = vst [vmem:[#allocation2] sm:$0x1] %v151_v12 }
  0xff   :  { %v235_v14 = vpop.f32.mrf.mxu1 }
 0x101   :  { %v323_v15 = vpop.f32.mrf.mxu1 }
 0x104   :  { %v164_v16 = vld [vmem:[#allocation2] sm:$0x1] }
 0x105   :  { %v236_v17 = vadd.f32 %v235_v14, %v164_v16 }
 0x107   :  { %336 = vtanh.f32 %v236_v17  ;;  %v297_v20 = vmul.f32 -1.442695, %v236_v17 }
 0x109   :  { %338 = vpow2.f32 %v297_v20 }
 0x114   :  { %v337_v18 = vpop.eup %336 }
 0x115   :  { %252 = vrot.lane.b32.xlu0 %v337_v18, %s460_s14 }
 0x116   :  { %v339_v21 = vpop.eup %338 }
 0x117   :  { %v242_v22 = vadd.f32 1.0, %v339_v21 }
 0x119   :  { %247 = vrot.lane.b32.xlu0 %v159_v19, %s461_s15  ;;  %340 = vrcp.f32 %v242_v22 }
 0x126   :  { %v341_v23 = vpop.eup %340 }
 0x187   :  { %v253_v24 = vpop.permute.xlu0 %252 }
 0x188   :  { %v255_v25 = vmul.f32 %v341_v23, %v253_v24 }
 0x18a   :  { %257 = vrot.lane.b32.xlu1 %v255_v25, %s461_s15 }
 0x18b   :  { %v248_v26 = vpop.permute.xlu0 %247 }
 0x18c   :  { %v250_v27 = vmul.f32 %v341_v23, %v248_v26 }
 0x1fc   :  { %v258_v28 = vpop.permute.xlu1 %257 }
 0x1fd   :  { %v260_v29 = vadd.f32 %v258_v28, %v250_v27 }
 0x1ff   :  { %342 = vtanh.f32 %v260_v29 }
 0x20c   :  { %v343_v30 = vpop.eup %342 }
 0x20d   :  { %263 = vrot.lane.b32.xlu1 %v343_v30, %s460_s14 }
 0x211   :  { %274 = vrot.lane.b32.xlu1 %v260_v29, %s462_s4 }
 0x27f   :  { %v264_v31 = vpop.permute.xlu1 %263 }
 0x280   :  { %v266_v32 = vmul.f32 %v341_v23, %v264_v31 }
 0x282   :  { %268 = vrot.lane.b32.xlu0 %v266_v32, %s461_s15 }
 0x283   :  { %v275_v33 = vpop.permute.xlu1 %274 }
 0x284   :  { %277 = vst.msk [vmem:[#allocation11 + $0x1] sm:$0x1] %vm271_vm4, %v275_v33 }
 0x2f4   :  { %v269_v34 = vpop.permute.xlu0 %268 }
 0x2f5   :  { %272 = vst.msk [vmem:[#allocation11] sm:$0x1] %vm271_vm4, %v269_v34 }
 0x2f6   :  { %435 = shalt.err (!%p432_p10)
}
 0x2f7   :  { %287 = dma.vmem_to_hbm [thread:$0]  %s285_s17, 32, %s517_s5, [#allocation5]  }
 0x2f8   :  { %450 = dma.done.wait [#allocation5], 32  }
 0x2f9   :  { %451 = vsyncadd [#allocation5], 4294967264 }
 0x2fa   :  { %291 = vsyncpa [#allocation4], 1 }
 0x2fb   :  { %292 = vsyncpa [#allocation7], 1 }
 0x2fc   :  { %293 = vsyncpa [#allocation10], 1 }
 0x2fd   :  { %294 = vsyncpa [#allocation5], 1 }

</bundles_post_ra>
